<compile_context>
chip_gen: v7x
topology: tpu7x:2x2x1
jax: 0.10.0
libtpu: 0.0.40
codegen_flags: <defaults>
</compile_context>

<pallas_src>
import functools

import jax
import jax.numpy as jnp
import numpy as np
from jax.experimental import pallas as pl
from jax.experimental.pallas import tpu as pltpu


def _fused_stack_kernel(mask_ref, x_ref, *refs, num_convs, Ho, Wo, Wp,
                        frame_len, store_off, ks, cs, bases, eps, neg_slope):
    """All ConvDropoutNormReLU blocks for one batch element, fully in VMEM.

    refs = [w_0, gamma_0, beta_0, ..., w_{L-1}, gamma_{L-1}, beta_{L-1},
            out_ref, frame_ref]

    Layout: every activation is a flat "frame" (C, frame_len) where the padded
    image (Hp, Wp) is flattened row-major onto lanes (plus one slack row).  A
    conv tap (kh, kw) is then a constant lane offset; each conv is accumulated
    per kernel row as (Co, KW*Ci) @ (KW*Ci, Ho*Wp) NT matmuls (lane-dense).
    Columns w >= Wo of the (Ho, Wp) output grid are junk and are zeroed with
    `mask` so they become the zero padding of the next frame.
    """
    L = num_convs
    out_ref = refs[3 * L]
    frame_ref = refs[3 * L + 1]
    f32 = jnp.float32
    Lout = Ho * Wp
    inv_n = 1.0 / float(Ho * Wo)
    act_dtype = frame_ref.dtype
    C_scr = frame_ref.shape[0]

    mask = mask_ref[...]                      # (1, Lout) f32 {0,1} valid columns

    # The intermediate frame is fully defined every grid step:
    #   [0, store_off)              : zeroed here (top pad + first left pad)
    #   [store_off, store_off+Lout) : overwritten by each layer's masked store
    #   [store_off+Lout, frame_len) : zeroed here (bottom pad + slack row)
    if L > 1:
        if store_off > 0:
            frame_ref[:, 0:store_off] = jnp.zeros((C_scr, store_off), act_dtype)
        tail = frame_len - (store_off + Lout)
        if tail > 0:
            frame_ref[:, store_off + Lout:frame_len] = jnp.zeros(
                (C_scr, tail), act_dtype)

    for i in range(L):
        w_ref = refs[3 * i]
        g_ref = refs[3 * i + 1]
        b_ref = refs[3 * i + 2]
        KH, KW = ks[i]
        Ci, Co = cs[i], cs[i + 1]
        bh, bw = bases[i]

        # Input frame for this layer (layer 0 reads the pre-padded x block,
        # later layers read the resident VMEM scratch written by layer i-1).
        fin = x_ref[0] if i == 0 else frame_ref[...]

        # Conv accumulated per kernel row: contraction depth KW*Ci per matmul.
        acc = None
        for kh in range(KH):
            slabs = []
            for kw in range(KW):
                d = (bh + kh) * Wp + (bw + kw)       # constant lane offset
                slabs.append(fin[0:Ci, d:d + Lout])  # (Ci, Ho*Wp)
            slab = jnp.concatenate(slabs, axis=0) if KW > 1 else slabs[0]
            part = jax.lax.dot_general(
                w_ref[kh], slab,                     # (Co, KW*Ci) @ (KW*Ci, Lout)
                dimension_numbers=(((1,), (0,)), ((), ())),
                preferred_element_type=f32)
            acc = part if acc is None else acc + part

        # conv bias omitted: exactly cancelled by the InstanceNorm mean
        # subtraction (dropout_op=None, norm follows conv, nonlin_first=False).
        # InstanceNorm2d in f32, lane reductions over the packed spatial axis;
        # junk columns masked out of the statistics.
        accm = acc * mask
        mean = jnp.sum(accm, axis=1, keepdims=True) * inv_n          # (Co, 1)
        var = jnp.maximum(
            jnp.sum(accm * accm, axis=1, keepdims=True) * inv_n - mean * mean,
            0.0)
        y = (accm - mean) * jax.lax.rsqrt(var + eps)
        y = y * g_ref[...] + b_ref[...]               # gamma/beta: (Co, 1)
        y = jnp.where(y >= 0, y, neg_slope * y)       # LeakyReLU
        y = y * mask                                  # junk cols -> 0 (= padding)

        if i < L - 1:
            # Single contiguous lane-dense store into the interior of the next
            # frame; the zeroed junk columns land exactly on its left/right pad.
            frame_ref[0:Co, store_off:store_off + Lout] = y.astype(act_dtype)
        else:
            out_ref[0] = y.astype(out_ref.dtype)      # lane-dense output store


def prepare_stacked_conv_params(params, in_channels, initial_stride):
    """Precompute kernel-layout weights ONCE (outside the per-call path).

    params[i]: dict with w (K,K,Cin,Cout) HWIO, b (Cout,), gamma (Cout,),
    beta (Cout,).  Only the first conv uses initial_stride.
    """
    L = len(params)
    ks, pads, ws = [], [], []
    K0 = params[0]["w"].shape[0]

    if initial_stride == 1:
        Cin0 = in_channels
        p0 = (K0 - 1) // 2
        ws.append(jnp.asarray(params[0]["w"]))
        ks.append((K0, K0))
        pads.append((p0, p0, p0, p0))
    elif initial_stride == 2:
        assert K0 == 3, "space-to-depth path assumes a 3x3 stride-2 first conv"
        Cin0 = 4 * in_channels
        w = jnp.asarray(params[0]["w"])              # (3,3,Cin,C1) HWIO
        C1 = w.shape[-1]
        # stride-2 3x3 conv == stride-1 2x2 conv over phase-folded channels
        # (channel index c2 = (ph*2 + pw)*Cin + c).
        w0 = jnp.zeros((2, 2, 4, in_channels, C1), w.dtype)
        dpk = [(0, 1, 0), (1, 0, 1), (1, 1, 2)]       # (tap d, phase, kernel k)
        for dh, ph, kh in dpk:
            for dw, pw_, kw in dpk:
                w0 = w0.at[dh, dw, ph * 2 + pw_].set(w[kh, kw])
        ws.append(w0.reshape(2, 2, Cin0, C1))
        ks.append((2, 2))
        pads.append((1, 0, 1, 0))                     # pad top/left only
    else:
        raise NotImplementedError("initial_stride must be 1 or 2")

    cs = [Cin0, params[0]["w"].shape[-1]]
    for i in range(1, L):
        Ki = params[i]["w"].shape[0]
        pi = (Ki - 1) // 2
        ws.append(jnp.asarray(params[i]["w"]))
        ks.append((Ki, Ki))
        pads.append((pi, pi, pi, pi))
        cs.append(params[i]["w"].shape[-1])

    # Kernel weight layout: (KH, Co, KW*Ci), column index kw*Ci + c  -> matches
    # the in-kernel per-kh slab (sublane concat over kw of (Ci, Ho*Wp) taps).
    ops = []
    for i in range(L):
        KH, KW = ks[i]
        Ci, Co = cs[i], cs[i + 1]
        w_k = jnp.transpose(ws[i], (0, 3, 1, 2)).reshape(KH, Co, KW * Ci)
        gamma = jnp.asarray(params[i]["gamma"]).reshape(Co, 1)
        beta = jnp.asarray(params[i]["beta"]).reshape(Co, 1)
        ops.append((w_k, gamma, beta))

    maxpad = (max(p[0] for p in pads), max(p[1] for p in pads),
              max(p[2] for p in pads), max(p[3] for p in pads))
    meta = dict(num_convs=L, ks=tuple(ks), cs=tuple(cs), pads=tuple(pads),
                initial_stride=initial_stride, maxpad=maxpad)
    return ops, meta


def stacked_conv_blocks(x_nchw, prepared, *, eps=1e-5, neg_slope=0.01):
    """Forward of StackedConvBlocks.  Input/output in PyTorch NCHW layout."""
    ops, meta = prepared
    L = meta["num_convs"]
    ks, cs, pads = meta["ks"], meta["cs"], meta["pads"]
    maxtop, maxbot, maxleft, maxright = meta["maxpad"]
    stride = meta["initial_stride"]

    N, C0, H, W = x_nchw.shape
    if stride == 2:
        assert H % 2 == 0 and W % 2 == 0
        Ho, Wo = H // 2, W // 2
        Cin0 = 4 * C0
        # space-to-depth (channels stay first -> already the kernel layout)
        x_s = (x_nchw.reshape(N, C0, Ho, 2, Wo, 2)
                     .transpose(0, 3, 5, 1, 2, 4)
                     .reshape(N, Cin0, Ho, Wo))
    else:
        Ho, Wo = H, W
        Cin0 = C0
        x_s = x_nchw
    assert Cin0 == cs[0]

    Hp = Ho + maxtop + maxbot
    Wp = Wo + maxleft + maxright
    frame_len = (Hp + 1) * Wp            # +1 slack row: tap reads past the last
                                         # valid row only feed junk columns
    store_off = maxtop * Wp + maxleft    # interior offset of valid data
    Lout = Ho * Wp

    # Layer-0 frame built on the XLA side: a single pad of the smallest tensor
    # (fuses with the space-to-depth transpose); the reshape is a free view.
    x_frame = jnp.pad(
        x_s, ((0, 0), (0, 0), (maxtop, maxbot + 1), (maxleft, maxright))
    ).reshape(N, Cin0, frame_len)

    # 0/1 mask of valid output columns within the (Ho, Wp) padded-width grid.
    col = np.arange(Lout) % Wp
    mask = jnp.asarray((col < Wo).astype(np.float32)).reshape(1, Lout)

    # Per-layer tap base offsets inside the common frame.
    bases = tuple((maxtop - p[0], maxleft - p[2]) for p in pads)

    operands = [mask, x_frame]
    in_specs = [pl.BlockSpec((1, Lout), lambda n: (0, 0)),
                pl.BlockSpec((1, Cin0, frame_len), lambda n: (n, 0, 0))]
    for i in range(L):
        w_k, gamma, beta = ops[i]
        operands += [w_k, gamma, beta]
        in_specs += [
            pl.BlockSpec(tuple(int(d) for d in w_k.shape), lambda n: (0, 0, 0)),
            pl.BlockSpec(tuple(int(d) for d in gamma.shape), lambda n: (0, 0)),
            pl.BlockSpec(tuple(int(d) for d in beta.shape), lambda n: (0, 0)),
        ]

    C_last = cs[-1]
    C_scr = max(cs[1:L]) if L > 1 else 8
    act_dtype = x_nchw.dtype
    isz = jnp.dtype(act_dtype).itemsize

    # VMEM budget derived from the actual per-grid-step footprint (+slack).
    blk = (Cin0 * frame_len + C_last * Lout) * isz + Lout * 4
    blk += sum(int(np.prod(a.shape)) * jnp.dtype(a.dtype).itemsize
               for trip in ops for a in trip)
    scratch_bytes = C_scr * frame_len * isz
    live = (max(cs[1:]) * Lout * 4
            + max(k[1] * c for k, c in zip(ks, cs[:-1])) * Lout * isz * 2)
    vmem_limit = int(min(96 * 2 ** 20,
                         max(32 * 2 ** 20, 4 * (2 * blk + scratch_bytes + live))))

    kernel = functools.partial(
        _fused_stack_kernel, num_convs=L, Ho=Ho, Wo=Wo, Wp=Wp,
        frame_len=frame_len, store_off=store_off, ks=ks, cs=cs,
        bases=bases, eps=eps, neg_slope=neg_slope)

    out_full = pl.pallas_call(
        kernel,
        out_shape=jax.ShapeDtypeStruct((N, C_last, Lout), act_dtype),
        grid=(N,),
        in_specs=in_specs,
        out_specs=pl.BlockSpec((1, C_last, Lout), lambda n: (n, 0, 0)),
        scratch_shapes=[pltpu.VMEM((C_scr, frame_len), act_dtype)],
        compiler_params=pltpu.CompilerParams(
            dimension_semantics=("parallel",),
            vmem_limit_bytes=vmem_limit),
    )(*operands)

    # Drop the Wp-Wo junk columns (already zeroed in-kernel); NCHW output.
    return out_full.reshape(N, C_last, Ho, Wp)[:, :, :, :Wo]


# ---------------- pure-JAX reference for correctness check ----------------
def _reference(x_nchw, params, *, initial_stride, eps=1e-5, neg_slope=0.01):
    x = x_nchw
    stride = initial_stride
    for p in params:
        w_oihw = jnp.transpose(p["w"], (3, 2, 0, 1))  # HWIO -> OIHW
        pad = (p["w"].shape[0] - 1) // 2
        x = jax.lax.conv_general_dilated(
            x, w_oihw, window_strides=(stride, stride),
            padding=((pad, pad), (pad, pad)),
            dimension_numbers=("NCHW", "OIHW", "NCHW"))
        x = x + p["b"][None, :, None, None]           # conv_bias=True
        mean = jnp.mean(x, axis=(2, 3), keepdims=True)
        var = jnp.mean((x - mean) ** 2, axis=(2, 3), keepdims=True)
        x = (x - mean) * jax.lax.rsqrt(var + eps)
        x = x * p["gamma"][None, :, None, None] + p["beta"][None, :, None, None]
        x = jnp.where(x >= 0, x, neg_slope * x)
        stride = 1
    return x


if __name__ == "__main__":
    # Module hyperparameters
    num_convs = 2
    Cin, Cout = 4, 8
    K = 3
    initial_stride = 2
    N, H, W = 2, 16, 16

    key = jax.random.PRNGKey(0)
    kx, *kps = jax.random.split(key, 1 + 4 * num_convs)
    x = jax.random.normal(kx, (N, Cin, H, W), dtype=jnp.float32)

    params = []
    c_in = Cin
    for i in range(num_convs):
        kw_, kb_, kg_, kbeta_ = kps[4 * i: 4 * i + 4]
        fan_in = c_in * K * K
        params.append(dict(
            w=jax.random.normal(kw_, (K, K, c_in, Cout), jnp.float32)
              / np.sqrt(fan_in),
            b=0.1 * jax.random.normal(kb_, (Cout,), jnp.float32),
            gamma=1.0 + 0.1 * jax.random.normal(kg_, (Cout,), jnp.float32),
            beta=0.1 * jax.random.normal(kbeta_, (Cout,), jnp.float32),
        ))
        c_in = Cout

    prepared = prepare_stacked_conv_params(params, Cin, initial_stride)
    out = jax.block_until_ready(stacked_conv_blocks(x, prepared))
    ref = jax.block_until_ready(
        _reference(x, params, initial_stride=initial_stride))

    np.testing.assert_allclose(np.asarray(out), np.asarray(ref),
                               rtol=1e-4, atol=1e-4)
    print("KERNEL_OK")
</pallas_src>

<mosaic_0001>
module attributes {stable_mosaic.version = 11 : i64} {
  func.func @_fused_stack_kernel(%arg0: i32, %arg1: memref<1x80xf32, #tpu.memory_space<vmem>>, %arg2: memref<1x16x110xf32, #tpu.memory_space<vmem>>, %arg3: memref<2x8x32xf32, #tpu.memory_space<vmem>>, %arg4: memref<8x1xf32, #tpu.memory_space<vmem>>, %arg5: memref<8x1xf32, #tpu.memory_space<vmem>>, %arg6: memref<3x8x24xf32, #tpu.memory_space<vmem>>, %arg7: memref<8x1xf32, #tpu.memory_space<vmem>>, %arg8: memref<8x1xf32, #tpu.memory_space<vmem>>, %arg9: memref<1x8x80xf32, #tpu.memory_space<vmem>>, %arg10: memref<8x110xf32, #tpu.memory_space<vmem>>) attributes {dimension_semantics = [#tpu.dimension_semantics<parallel>], iteration_bounds = array<i64: 2>, scalar_prefetch = 0 : i64, scratch_operands = 1 : i64, tpu.core_type = #tpu.core_type<tc>, window_params = [{pipeline_mode = #tpu.pipeline_mode<synchronous>, transform_indices = @transform_0, window_bounds = array<i64: 1, 80>}, {transform_indices = @transform_1, window_bounds = array<i64: 1, 16, 110>}, {pipeline_mode = #tpu.pipeline_mode<synchronous>, transform_indices = @transform_2, window_bounds = array<i64: 2, 8, 32>}, {pipeline_mode = #tpu.pipeline_mode<synchronous>, transform_indices = @transform_3, window_bounds = array<i64: 8, 1>}, {pipeline_mode = #tpu.pipeline_mode<synchronous>, transform_indices = @transform_4, window_bounds = array<i64: 8, 1>}, {pipeline_mode = #tpu.pipeline_mode<synchronous>, transform_indices = @transform_5, window_bounds = array<i64: 3, 8, 24>}, {pipeline_mode = #tpu.pipeline_mode<synchronous>, transform_indices = @transform_6, window_bounds = array<i64: 8, 1>}, {pipeline_mode = #tpu.pipeline_mode<synchronous>, transform_indices = @transform_7, window_bounds = array<i64: 8, 1>}, {transform_indices = @transform_8, window_bounds = array<i64: 1, 8, 80>}]} {
    %c0 = arith.constant 0 : index
    %c0_0 = arith.constant 0 : index
    %0 = vector.load %arg1[%c0, %c0_0] : memref<1x80xf32, #tpu.memory_space<vmem>>, vector<1x80xf32>
    %cst = arith.constant 0.000000e+00 : f32
    %1 = vector.broadcast %cst : f32 to vector<8x11xf32>
    %c0_1 = arith.constant 0 : index
    %c0_2 = arith.constant 0 : index
    %2 = vector.load %arg10[%c0_1, %c0_2] : memref<8x110xf32, #tpu.memory_space<vmem>>, vector<8x11xf32>
    tpu.vector_store %arg10[%c0_1, %c0_2], %1 {strides = array<i32>} : memref<8x110xf32, #tpu.memory_space<vmem>>, vector<8x11xf32>,
    %cst_3 = arith.constant 0.000000e+00 : f32
    %3 = vector.broadcast %cst_3 : f32 to vector<8x19xf32>
    %c0_4 = arith.constant 0 : index
    %c91 = arith.constant 91 : index
    %4 = vector.load %arg10[%c0_4, %c91] : memref<8x110xf32, #tpu.memory_space<vmem>>, vector<8x19xf32>
    tpu.vector_store %arg10[%c0_4, %c91], %3 {strides = array<i32>} : memref<8x110xf32, #tpu.memory_space<vmem>>, vector<8x19xf32>,
    %c0_5 = arith.constant 0 : index
    %c0_6 = arith.constant 0 : index
    %c0_7 = arith.constant 0 : index
    %5 = vector.load %arg2[%c0_5, %c0_6, %c0_7] : memref<1x16x110xf32, #tpu.memory_space<vmem>>, vector<1x16x110xf32>
    %6 = vector.shape_cast %5 : vector<1x16x110xf32> to vector<16x110xf32>
    %7 = vector.extract_strided_slice %6 {offsets = [0, 0], sizes = [16, 80], strides = [1, 1]} : vector<16x110xf32> to vector<16x80xf32>
    %8 = vector.extract_strided_slice %6 {offsets = [0, 1], sizes = [16, 80], strides = [1, 1]} : vector<16x110xf32> to vector<16x80xf32>
    %9 = tpu.concatenate %7, %8 in 0 : vector<16x80xf32>, vector<16x80xf32> -> vector<32x80xf32>
    %c0_8 = arith.constant 0 : index
    %c0_9 = arith.constant 0 : index
    %c0_10 = arith.constant 0 : index
    %10 = vector.load %arg3[%c0_8, %c0_9, %c0_10] : memref<2x8x32xf32, #tpu.memory_space<vmem>>, vector<1x8x32xf32>
    %11 = vector.shape_cast %10 : vector<1x8x32xf32> to vector<8x32xf32>
    %cst_11 = arith.constant dense<0.000000e+00> : vector<8x80xf32>
    %12 = tpu.matmul %11, %9, %cst_11 {dimension_numbers = #tpu.dot_dimension_numbers<[1], [0], [0], [1], [0, 0, 1, 1], [], []>} : vector<8x32xf32>, vector<32x80xf32>, vector<8x80xf32> -> vector<8x80xf32>
    %13 = vector.extract_strided_slice %6 {offsets = [0, 10], sizes = [16, 80], strides = [1, 1]} : vector<16x110xf32> to vector<16x80xf32>
    %14 = vector.extract_strided_slice %6 {offsets = [0, 11], sizes = [16, 80], strides = [1, 1]} : vector<16x110xf32> to vector<16x80xf32>
    %15 = tpu.concatenate %13, %14 in 0 : vector<16x80xf32>, vector<16x80xf32> -> vector<32x80xf32>
    %c1 = arith.constant 1 : index
    %c0_12 = arith.constant 0 : index
    %c0_13 = arith.constant 0 : index
    %16 = vector.load %arg3[%c1, %c0_12, %c0_13] : memref<2x8x32xf32, #tpu.memory_space<vmem>>, vector<1x8x32xf32>
    %17 = vector.shape_cast %16 : vector<1x8x32xf32> to vector<8x32xf32>
    %cst_14 = arith.constant dense<0.000000e+00> : vector<8x80xf32>
    %18 = tpu.matmul %17, %15, %cst_14 {dimension_numbers = #tpu.dot_dimension_numbers<[1], [0], [0], [1], [0, 0, 1, 1], [], []>} : vector<8x32xf32>, vector<32x80xf32>, vector<8x80xf32> -> vector<8x80xf32>
    %19 = arith.addf %12, %18 : vector<8x80xf32>
    %20 = vector.broadcast %0 : vector<1x80xf32> to vector<8x80xf32>
    %21 = arith.mulf %19, %20 : vector<8x80xf32>
    %cst_15 = arith.constant dense<0.000000e+00> : vector<8xf32>
    %22 = vector.multi_reduction <add>, %21, %cst_15 [1] : vector<8x80xf32> to vector<8xf32>
    %23 = vector.shape_cast %22 : vector<8xf32> to vector<8x1xf32>
    %cst_16 = arith.constant 1.562500e-02 : f32
    %24 = vector.broadcast %cst_16 : f32 to vector<8x1xf32>
    %25 = arith.mulf %23, %24 : vector<8x1xf32>
    %26 = arith.mulf %21, %21 : vector<8x80xf32>
    %cst_17 = arith.constant dense<0.000000e+00> : vector<8xf32>
    %27 = vector.multi_reduction <add>, %26, %cst_17 [1] : vector<8x80xf32> to vector<8xf32>
    %28 = vector.shape_cast %27 : vector<8xf32> to vector<8x1xf32>
    %cst_18 = arith.constant 1.562500e-02 : f32
    %29 = vector.broadcast %cst_18 : f32 to vector<8x1xf32>
    %30 = arith.mulf %28, %29 : vector<8x1xf32>
    %31 = arith.mulf %25, %25 : vector<8x1xf32>
    %32 = arith.subf %30, %31 : vector<8x1xf32>
    %cst_19 = arith.constant 0.000000e+00 : f32
    %33 = vector.broadcast %cst_19 : f32 to vector<8x1xf32>
    %34 = arith.maximumf %32, %33 : vector<8x1xf32>
    %35 = vector.broadcast %25 : vector<8x1xf32> to vector<8x80xf32>
    %36 = arith.subf %21, %35 : vector<8x80xf32>
    %cst_20 = arith.constant 9.99999974E-6 : f32
    %37 = vector.broadcast %cst_20 : f32 to vector<8x1xf32>
    %38 = arith.addf %34, %37 : vector<8x1xf32>
    %39 = math.rsqrt %38 : vector<8x1xf32>
    %40 = vector.broadcast %39 : vector<8x1xf32> to vector<8x80xf32>
    %41 = arith.mulf %36, %40 : vector<8x80xf32>
    %c0_21 = arith.constant 0 : index
    %c0_22 = arith.constant 0 : index
    %42 = vector.load %arg4[%c0_21, %c0_22] : memref<8x1xf32, #tpu.memory_space<vmem>>, vector<8x1xf32>
    %43 = vector.broadcast %42 : vector<8x1xf32> to vector<8x80xf32>
    %44 = arith.mulf %41, %43 : vector<8x80xf32>
    %c0_23 = arith.constant 0 : index
    %c0_24 = arith.constant 0 : index
    %45 = vector.load %arg5[%c0_23, %c0_24] : memref<8x1xf32, #tpu.memory_space<vmem>>, vector<8x1xf32>
    %46 = vector.broadcast %45 : vector<8x1xf32> to vector<8x80xf32>
    %47 = arith.addf %44, %46 : vector<8x80xf32>
    %cst_25 = arith.constant 0.000000e+00 : f32
    %48 = vector.broadcast %cst_25 : f32 to vector<8x80xf32>
    %49 = arith.cmpf oge, %47, %48 : vector<8x80xf32>
    %cst_26 = arith.constant 0.00999999977 : f32
    %50 = vector.broadcast %cst_26 : f32 to vector<8x80xf32>
    %51 = arith.mulf %50, %47 : vector<8x80xf32>
    %52 = arith.select %49, %47, %51 : vector<8x80xi1>, vector<8x80xf32>
    %53 = vector.broadcast %0 : vector<1x80xf32> to vector<8x80xf32>
    %54 = arith.mulf %52, %53 : vector<8x80xf32>
    %c0_27 = arith.constant 0 : index
    %c11 = arith.constant 11 : index
    %55 = vector.load %arg10[%c0_27, %c11] : memref<8x110xf32, #tpu.memory_space<vmem>>, vector<8x80xf32>
    tpu.vector_store %arg10[%c0_27, %c11], %54 {strides = array<i32>} : memref<8x110xf32, #tpu.memory_space<vmem>>, vector<8x80xf32>,
    %c0_28 = arith.constant 0 : index
    %c0_29 = arith.constant 0 : index
    %56 = vector.load %arg10[%c0_28, %c0_29] : memref<8x110xf32, #tpu.memory_space<vmem>>, vector<8x110xf32>
    %57 = vector.extract_strided_slice %56 {offsets = [0, 0], sizes = [8, 80], strides = [1, 1]} : vector<8x110xf32> to vector<8x80xf32>
    %58 = vector.extract_strided_slice %56 {offsets = [0, 1], sizes = [8, 80], strides = [1, 1]} : vector<8x110xf32> to vector<8x80xf32>
    %59 = vector.extract_strided_slice %56 {offsets = [0, 2], sizes = [8, 80], strides = [1, 1]} : vector<8x110xf32> to vector<8x80xf32>
    %60 = tpu.concatenate %57, %58, %59 in 0 : vector<8x80xf32>, vector<8x80xf32>, vector<8x80xf32> -> vector<24x80xf32>
    %c0_30 = arith.constant 0 : index
    %c0_31 = arith.constant 0 : index
    %c0_32 = arith.constant 0 : index
    %61 = vector.load %arg6[%c0_30, %c0_31, %c0_32] : memref<3x8x24xf32, #tpu.memory_space<vmem>>, vector<1x8x24xf32>
    %62 = vector.shape_cast %61 : vector<1x8x24xf32> to vector<8x24xf32>
    %cst_33 = arith.constant dense<0.000000e+00> : vector<8x80xf32>
    %63 = tpu.matmul %62, %60, %cst_33 {dimension_numbers = #tpu.dot_dimension_numbers<[1], [0], [0], [1], [0, 0, 1, 1], [], []>} : vector<8x24xf32>, vector<24x80xf32>, vector<8x80xf32> -> vector<8x80xf32>
    %64 = vector.extract_strided_slice %56 {offsets = [0, 10], sizes = [8, 80], strides = [1, 1]} : vector<8x110xf32> to vector<8x80xf32>
    %65 = vector.extract_strided_slice %56 {offsets = [0, 11], sizes = [8, 80], strides = [1, 1]} : vector<8x110xf32> to vector<8x80xf32>
    %66 = vector.extract_strided_slice %56 {offsets = [0, 12], sizes = [8, 80], strides = [1, 1]} : vector<8x110xf32> to vector<8x80xf32>
    %67 = tpu.concatenate %64, %65, %66 in 0 : vector<8x80xf32>, vector<8x80xf32>, vector<8x80xf32> -> vector<24x80xf32>
    %c1_34 = arith.constant 1 : index
    %c0_35 = arith.constant 0 : index
    %c0_36 = arith.constant 0 : index
    %68 = vector.load %arg6[%c1_34, %c0_35, %c0_36] : memref<3x8x24xf32, #tpu.memory_space<vmem>>, vector<1x8x24xf32>
    %69 = vector.shape_cast %68 : vector<1x8x24xf32> to vector<8x24xf32>
    %cst_37 = arith.constant dense<0.000000e+00> : vector<8x80xf32>
    %70 = tpu.matmul %69, %67, %cst_37 {dimension_numbers = #tpu.dot_dimension_numbers<[1], [0], [0], [1], [0, 0, 1, 1], [], []>} : vector<8x24xf32>, vector<24x80xf32>, vector<8x80xf32> -> vector<8x80xf32>
    %71 = arith.addf %63, %70 : vector<8x80xf32>
    %72 = vector.extract_strided_slice %56 {offsets = [0, 20], sizes = [8, 80], strides = [1, 1]} : vector<8x110xf32> to vector<8x80xf32>
    %73 = vector.extract_strided_slice %56 {offsets = [0, 21], sizes = [8, 80], strides = [1, 1]} : vector<8x110xf32> to vector<8x80xf32>
    %74 = vector.extract_strided_slice %56 {offsets = [0, 22], sizes = [8, 80], strides = [1, 1]} : vector<8x110xf32> to vector<8x80xf32>
    %75 = tpu.concatenate %72, %73, %74 in 0 : vector<8x80xf32>, vector<8x80xf32>, vector<8x80xf32> -> vector<24x80xf32>
    %c2 = arith.constant 2 : index
    %c0_38 = arith.constant 0 : index
    %c0_39 = arith.constant 0 : index
    %76 = vector.load %arg6[%c2, %c0_38, %c0_39] : memref<3x8x24xf32, #tpu.memory_space<vmem>>, vector<1x8x24xf32>
    %77 = vector.shape_cast %76 : vector<1x8x24xf32> to vector<8x24xf32>
    %cst_40 = arith.constant dense<0.000000e+00> : vector<8x80xf32>
    %78 = tpu.matmul %77, %75, %cst_40 {dimension_numbers = #tpu.dot_dimension_numbers<[1], [0], [0], [1], [0, 0, 1, 1], [], []>} : vector<8x24xf32>, vector<24x80xf32>, vector<8x80xf32> -> vector<8x80xf32>
    %79 = arith.addf %71, %78 : vector<8x80xf32>
    %80 = vector.broadcast %0 : vector<1x80xf32> to vector<8x80xf32>
    %81 = arith.mulf %79, %80 : vector<8x80xf32>
    %cst_41 = arith.constant dense<0.000000e+00> : vector<8xf32>
    %82 = vector.multi_reduction <add>, %81, %cst_41 [1] : vector<8x80xf32> to vector<8xf32>
    %83 = vector.shape_cast %82 : vector<8xf32> to vector<8x1xf32>
    %cst_42 = arith.constant 1.562500e-02 : f32
    %84 = vector.broadcast %cst_42 : f32 to vector<8x1xf32>
    %85 = arith.mulf %83, %84 : vector<8x1xf32>
    %86 = arith.mulf %81, %81 : vector<8x80xf32>
    %cst_43 = arith.constant dense<0.000000e+00> : vector<8xf32>
    %87 = vector.multi_reduction <add>, %86, %cst_43 [1] : vector<8x80xf32> to vector<8xf32>
    %88 = vector.shape_cast %87 : vector<8xf32> to vector<8x1xf32>
    %cst_44 = arith.constant 1.562500e-02 : f32
    %89 = vector.broadcast %cst_44 : f32 to vector<8x1xf32>
    %90 = arith.mulf %88, %89 : vector<8x1xf32>
    %91 = arith.mulf %85, %85 : vector<8x1xf32>
    %92 = arith.subf %90, %91 : vector<8x1xf32>
    %cst_45 = arith.constant 0.000000e+00 : f32
    %93 = vector.broadcast %cst_45 : f32 to vector<8x1xf32>
    %94 = arith.maximumf %92, %93 : vector<8x1xf32>
    %95 = vector.broadcast %85 : vector<8x1xf32> to vector<8x80xf32>
    %96 = arith.subf %81, %95 : vector<8x80xf32>
    %cst_46 = arith.constant 9.99999974E-6 : f32
    %97 = vector.broadcast %cst_46 : f32 to vector<8x1xf32>
    %98 = arith.addf %94, %97 : vector<8x1xf32>
    %99 = math.rsqrt %98 : vector<8x1xf32>
    %100 = vector.broadcast %99 : vector<8x1xf32> to vector<8x80xf32>
    %101 = arith.mulf %96, %100 : vector<8x80xf32>
    %c0_47 = arith.constant 0 : index
    %c0_48 = arith.constant 0 : index
    %102 = vector.load %arg7[%c0_47, %c0_48] : memref<8x1xf32, #tpu.memory_space<vmem>>, vector<8x1xf32>
    %103 = vector.broadcast %102 : vector<8x1xf32> to vector<8x80xf32>
    %104 = arith.mulf %101, %103 : vector<8x80xf32>
    %c0_49 = arith.constant 0 : index
    %c0_50 = arith.constant 0 : index
    %105 = vector.load %arg8[%c0_49, %c0_50] : memref<8x1xf32, #tpu.memory_space<vmem>>, vector<8x1xf32>
    %106 = vector.broadcast %105 : vector<8x1xf32> to vector<8x80xf32>
    %107 = arith.addf %104, %106 : vector<8x80xf32>
    %cst_51 = arith.constant 0.000000e+00 : f32
    %108 = vector.broadcast %cst_51 : f32 to vector<8x80xf32>
    %109 = arith.cmpf oge, %107, %108 : vector<8x80xf32>
    %cst_52 = arith.constant 0.00999999977 : f32
    %110 = vector.broadcast %cst_52 : f32 to vector<8x80xf32>
    %111 = arith.mulf %110, %107 : vector<8x80xf32>
    %112 = arith.select %109, %107, %111 : vector<8x80xi1>, vector<8x80xf32>
    %113 = vector.broadcast %0 : vector<1x80xf32> to vector<8x80xf32>
    %114 = arith.mulf %112, %113 : vector<8x80xf32>
    %c0_53 = arith.constant 0 : index
    %c0_54 = arith.constant 0 : index
    %c0_55 = arith.constant 0 : index
    %115 = vector.load %arg9[%c0_53, %c0_54, %c0_55] : memref<1x8x80xf32, #tpu.memory_space<vmem>>, vector<1x8x80xf32>
    %116 = vector.shape_cast %115 : vector<1x8x80xf32> to vector<8x80xf32>
    %117 = vector.shape_cast %114 : vector<8x80xf32> to vector<1x8x80xf32>
    tpu.vector_store %arg9[%c0_53, %c0_54, %c0_55], %117 {strides = array<i32>} : memref<1x8x80xf32, #tpu.memory_space<vmem>>, vector<1x8x80xf32>,
    return
  }
  func.func @transform_0(%arg0: i32) -> (i32, i32) {
    %c0_i32 = arith.constant 0 : i32
    %c0_i32_0 = arith.constant 0 : i32
    %c0_i32_1 = arith.constant 0 : i32
    return %c0_i32, %c0_i32_0 : i32, i32
  }
  func.func @transform_1(%arg0: i32) -> (i32, i32, i32) {
    %c0_i32 = arith.constant 0 : i32
    %c0_i32_0 = arith.constant 0 : i32
    %c0_i32_1 = arith.constant 0 : i32
    return %arg0, %c0_i32, %c0_i32_0 : i32, i32, i32
  }
  func.func @transform_2(%arg0: i32) -> (i32, i32, i32) {
    %c0_i32 = arith.constant 0 : i32
    %c0_i32_0 = arith.constant 0 : i32
    %c0_i32_1 = arith.constant 0 : i32
    %c0_i32_2 = arith.constant 0 : i32
    return %c0_i32, %c0_i32_0, %c0_i32_1 : i32, i32, i32
  }
  func.func @transform_3(%arg0: i32) -> (i32, i32) {
    %c0_i32 = arith.constant 0 : i32
    %c0_i32_0 = arith.constant 0 : i32
    %c0_i32_1 = arith.constant 0 : i32
    return %c0_i32, %c0_i32_0 : i32, i32
  }
  func.func @transform_4(%arg0: i32) -> (i32, i32) {
    %c0_i32 = arith.constant 0 : i32
    %c0_i32_0 = arith.constant 0 : i32
    %c0_i32_1 = arith.constant 0 : i32
    return %c0_i32, %c0_i32_0 : i32, i32
  }
  func.func @transform_5(%arg0: i32) -> (i32, i32, i32) {
    %c0_i32 = arith.constant 0 : i32
    %c0_i32_0 = arith.constant 0 : i32
    %c0_i32_1 = arith.constant 0 : i32
    %c0_i32_2 = arith.constant 0 : i32
    return %c0_i32, %c0_i32_0, %c0_i32_1 : i32, i32, i32
  }
  func.func @transform_6(%arg0: i32) -> (i32, i32) {
    %c0_i32 = arith.constant 0 : i32
    %c0_i32_0 = arith.constant 0 : i32
    %c0_i32_1 = arith.constant 0 : i32
    return %c0_i32, %c0_i32_0 : i32, i32
  }
  func.func @transform_7(%arg0: i32) -> (i32, i32) {
    %c0_i32 = arith.constant 0 : i32
    %c0_i32_0 = arith.constant 0 : i32
    %c0_i32_1 = arith.constant 0 : i32
    return %c0_i32, %c0_i32_0 : i32, i32
  }
  func.func @transform_8(%arg0: i32) -> (i32, i32, i32) {
    %c0_i32 = arith.constant 0 : i32
    %c0_i32_0 = arith.constant 0 : i32
    %c0_i32_1 = arith.constant 0 : i32
    return %arg0, %c0_i32, %c0_i32_0 : i32, i32, i32
  }
}

</mosaic_0001>

<bundles_post_ra>
// kernel: tpu_custom_call.1
= control target key start
LH: loop header
LB: loop body
LE: loop exit
PB: predicated region body
PF: predicated region fallthrough
CT: control target
= control target key end

     0   :  { %13 = vsyncpa [#allocation4], 0  ;;  %s1580_s0 = inlined_call_operand.vmem [shape: f32[1,80], index: 0, kind: input, shape index: {}]   ;;  %s1581_s1 = inlined_call_operand.vmem [shape: f32[2,16,110], index: 1, kind: input, shape index: {}]   ;;  %s1582_s2 = inlined_call_operand.hbm [shape: f32[2,8,32], index: 2, kind: input, shape index: {}]   ;;  %s1583_s3 = inlined_call_operand.vmem [shape: f32[8,1], index: 3, kind: input, shape index: {}]   ;;  %s1584_s4 = inlined_call_operand.vmem [shape: f32[8,1], index: 4, kind: input, shape index: {}]   ;;  %s1585_s5 = inlined_call_operand.hbm [shape: f32[3,8,24], index: 5, kind: input, shape index: {}]   ;;  %s1586_s6 = inlined_call_operand.vmem [shape: f32[8,1], index: 6, kind: input, shape index: {}]   ;;  %s1587_s7 = inlined_call_operand.vmem [shape: f32[8,1], index: 7, kind: input, shape index: {}]   ;;  %s1588_s8 = inlined_call_operand.hbm [shape: f32[2,8,80], index: 8, kind: output, shape index: {}]  }
   0x1   :  { %14 = vsyncpa [#allocation7], 0 }
   0x2   :  { %15 = vsyncpa [#allocation5], 0 }
   0x3   :  { %17 = vsyncpa [#allocation5 + $0x1], 0  ;;  %s1351_s27 = smov 0   ;;  %s1353_s28 = smov 0  }
   0x4   :  { %s1355_s29 = smov 0   ;;  %s1357_s30 = smov 0  }
   0x5 LB: > { %1593 = sst [smem:[#allocation12_spill]] %s1286_s29  ;;  %s1372_s9 = sadd.s32 4294967295, %s1290_s30   ;;  %s1290_s30 = sphi %s1357_s30, %s1610_s30   ;;  %s1286_s29 = sphi %s1355_s29, %s1607_s29   ;;  %s1282_s28 = sphi %s1353_s28, %s1609_s28   ;;  %s1278_s27 = sphi %s1351_s27, %s1608_s27  }
   0x6   : > { %s942_s10 = sadd.s32 4294967294, %s1290_s30   ;;  %s1376_s11 = sadd.s32 1, %s1290_s30  }
   0x7   : > { %s203_s12 = sadd.s32 1, %s1286_s29  ;;  %s200_s13 = ssub.s32 %s1290_s30, %s1376_s11 }
   0x8   : > { %p213_p0 = scmp.ne.s32.totalorder %s1286_s29, %s1282_s28  ;;  %p201_p1 = scmp.eq.s32.totalorder %s200_s13, 0 }
   0x9   : > { %p214_p2 = scmp.eq.s32.totalorder %s1372_s9, 1  ;;  %p219_p3 = scmp.ne.s32.totalorder %s1282_s28, %s1278_s27 }
   0xa   : > { %p220_p4 = scmp.eq.s32.totalorder %s942_s10, 1  ;;  %p943_p7 = scmp.ge.s32.totalorder %s1290_s30, 1 }
   0xb   : > { %s1387_s14 = scalar_select %p201_p1, %s1286_s29, %s203_s12  }
   0xc   : > { %p1389_p5 = por %p214_p2, %p213_p0  ;;  %p1393_p6 = por %p220_p4, %p219_p3 }
   0xd   : > { %1594 = sst [smem:[#allocation13_spill]] %s1387_s14  ;;  %p227_p8 = scmp.lt.s32.totalorder %s1290_s30, 3 }
   0xe   : > { %s1595_s15 = scalar_select %p1389_p5, 1, 0 }
   0xf   : > { %s1596_s16 = scalar_select %p1393_p6, 1, 0 }
  0x10   : > { %p1589_p9 = scmp.eq.s32.totalorder %s1372_s9, 0  ;;  %p1400_p10 = pnand %p943_p7, %p227_p8 }
  0x11   : > { %s1292_s18 = smov [#allocation3]   ;;  %s1293_s21 = smov [#allocation6]  }
  0x12   : > { %s1597_s17 = scalar_select %p1400_p10, 1, 0 }
  0x13   : > { %s242_s19 = sshll.u32 %s1292_s18, 4  ;;  %p1072_p11 = pneg %p1400_p10  ;;  %s243_s19 = int_to_ptr.vmem [resolvable:$true] %s242_s19 }
  0x14   : > { %s261_s22 = sshll.u32 %s1293_s21, 4  ;;  %s1164_s25 = scalar_lea.hbm %s1582_s2, 256  ;;  %s1412_s22 = int_to_ptr.vmem [resolvable:$true] %s261_s22 }
  0x15   : > { %p1408_p12 = pnand %p1589_p9, %p1072_p11  ;;  %p1165_p13 = scmp.ne.s32.totalorder %s1582_s2, %s1164_s25 }
  0x16   : > { %p1171_p3 = scmp.lt.u32.totalorder %s1164_s25, %s1582_s2 }
  0x17   : > { %p1166_p0 = pneg %p1408_p12 }
  0x19   : > { %p1167_p1 = pnand %p1166_p0, %p1165_p13 }
  0x1b   : > { %p1168_p2 = pneg %p1167_p1 }
  0x1d   : > { %p1173_p4 = pnand %p1171_p3, %p1168_p2 }
  0x1f   : > { %1176 = shalt.err (!%p1173_p4)
}
  0x20   : > { %s1177_s18 = scalar_lea.vmem %s243_s19, 256  ;;  %p1185_p9 = scmp.lt.s32.totalorder %s243_s19, %s243_s19 }
  0x21   : > { %p1178_p7 = scmp.ne.s32.totalorder %s243_s19, %s1177_s18  ;;  %p1186_p6 = scmp.lt.s32.totalorder %s1177_s18, %s1177_s18 }
  0x23   : > { %p1180_p8 = pnand %p1178_p7, %p1166_p0  ;;  %p1187_p5 = por %p1186_p6, %p1185_p9 }
  0x25   : > { %p1181_p11 = pneg %p1180_p8 }
  0x27   : > { %p1188_p10 = pnand %p1187_p5, %p1181_p11 }
  0x29   : > { %1191 = shalt.err (!%p1188_p10)
}
  0x2a   : > { %s1294_s21 = smov 128   ;;  %s1295_s23 = smov 8  }
  0x2b   : > { %1075 = dma.hbm_to_vmem [thread:$0]  (!%p1408_p12), %s1582_s2, 256, %s243_s19, [#allocation4], %s1294_s21, %s1294_s21, %s1295_s23  }
  0x2c   : > { %s1192_s12 = scalar_lea.hbm %s1585_s5, 384 }
  0x2d   : > { %p1193_p13 = scmp.ne.s32.totalorder %s1585_s5, %s1192_s12  ;;  %p1199_p9 = scmp.lt.u32.totalorder %s1192_s12, %s1585_s5 }
  0x2f   : > { %p1195_p5 = pnand %p1193_p13, %p1166_p0 }
  0x31   : > { %p1196_p6 = pneg %p1195_p5 }
  0x33   : > { %p1201_p10 = pnand %p1199_p9, %p1196_p6 }
  0x35   : > { %1204 = shalt.err (!%p1201_p10)
}
  0x36   : > { %s1205_s19 = scalar_lea.vmem %s1412_s22, 384  ;;  %p1213_p4 = scmp.lt.s32.totalorder %s1412_s22, %s1412_s22 }
  0x37   : > { %p1206_p1 = scmp.ne.s32.totalorder %s1412_s22, %s1205_s19  ;;  %p1214_p7 = scmp.lt.s32.totalorder %s1205_s19, %s1205_s19 }
  0x39   : > { %p1208_p2 = pnand %p1206_p1, %p1166_p0  ;;  %p1215_p8 = por %p1214_p7, %p1213_p4 }
  0x3b   : > { %p1209_p3 = pneg %p1208_p2 }
  0x3d   : > { %p1216_p11 = pnand %p1215_p8, %p1209_p3 }
  0x3f   : > { %1219 = shalt.err (!%p1216_p11)
}
  0x40   : > { %1078 = dma.hbm_to_vmem [thread:$0]  (!%p1408_p12), %s1585_s5, 384, %s1412_s22, [#allocation7], %s1294_s21, %s1294_s21, %s1295_s23  }
  0x41   : > { %p1599_p13 = scmp.ne.s32.totalorder %s1597_s17, 0 }
  0x42   : > { %p1600_p5 = scmp.eq.s32.totalorder (!%p1599_p13), %s1372_s9, 0 }
  0x43   : > { %291 = sbr.rel (%p1599_p13) target bundleno = 1505 (0x5e1), region = 52 }
  0x4a   : > { %1265 = dma.done.wait (%p1600_p5), [#allocation4], 256   ;;  %p1601_p0 = pmov %p1600_p5 }
  0x4c   : > { %1267 = vsyncadd (%p1601_p0), [#allocation4], 4294967040  ;;  %p1602_p6 = pmov %p1601_p0 }
  0x4d   : > { %p1603_p9 = pmov %p1601_p0 }
  0x4e   : > { %1269 = dma.done.wait (%p1602_p6), [#allocation7], 384  }
  0x4f   : > { %1271 = vsyncadd (%p1603_p9), [#allocation7], 4294966912  ;;  %p329_p10 = scmp.lt.s32.totalorder %s1372_s9, 1  ;;  %v1296_v0 = vmov 0.0|0.0   ;;  %s1297_s24 = smov 127   ;;  %vm1299_vm0 = vmmov 0  }
  0x50   : > { %1035 = vmatprep.subr.bf16.mxu0 %v1296_v0  ;;  %1047 = vmatprep.subr.bf16.mxu1 %v1296_v0  ;;  %s1298_s25 = smov 118   ;;  %v1300_v5 = vmov 0.0   ;;  %v351_v18 = vld [vmem:[#allocation3 + $0x8] sm:$0xff]  ;;  %vm364_vm1 = vcmask 261120   ;;  %v349_v19 = vld [vmem:[#allocation3] sm:$0xff]  ;;  %v1301_v20 = vmov 0  }
  0x51   : > { %s330_s20 = scalar_select %p329_p10, %s1372_s9, 1  ;;  %994 = vmatprep.mubr.msk.f32.mxu0 %vm1299_vm0, %v1300_v5  ;;  %1014 = vmatprep.mubr.msk.f32.mxu1 %vm1299_vm0, %v1300_v5  ;;  %v1493_v21 = vld [vmem:[%s1580_s0] ss:$0 sm:$0xff]  ;;  %vm518_vm2 = vcmask 654336   ;;  %vm335_vm3 = vcmask 89088   ;;  %vm337_vm4 = vcmask 900824  }
  0x52   : > { %1148 = vset.pattern.permute.xlu0 %v1301_v20  ;;  %1149 = vset.pattern.permute.xlu1 %v1301_v20  ;;  %v542_v28 = vld [vmem:[%s1584_s4] sm:$0xff]  ;;  %336 = vst.msk [vmem:[#allocation2] sm:$0xff] %vm335_vm3, %v1300_v5  ;;  %s1302_s29 = smov 11   ;;  %vm557_vm6 = vcmask 744536   ;;  %s1303_s14 = smov 126   ;;  %vm579_vm7 = vcmask 195584  }
  0x53   : > { %s963_s17 = sshll.u32 %s330_s20, 4  ;;  %v535_v29 = vld [vmem:[%s1583_s3] sm:$0xff]  ;;  %338 = vst.msk [vmem:[#allocation2] sm:$0xff] %vm337_vm4, %v1300_v5  ;;  %s1304_s20 = smov 108   ;;  %v567_v63 = vld [vmem:[#allocation6] sm:$0xff] }
  0x54   : > { %s333_s23 = scalar_lea.vmem %s1581_s1, %s963_s17  ;;  %v569_v58 = vld [vmem:[#allocation6 + $0x8] sm:$0xff]  ;;  %s960_s26 = sshll.u32 %s1372_s9, 7 }
  0x55   : > { %v339_v1 = vld [vmem:[%s333_s23] sm:$0xff]  ;;  %v340_v2 = vld [vmem:[%s333_s23 + $0x8] sm:$0xff]  ;;  %s1537_s19 = scalar_lea.hbm %s1588_s8, %s960_s26  ;;  %p1604_p1 = scmp.ne.s32.totalorder %s1595_s15, 0 }
  0x56   : > { %v1133_v3 = vpack.i.bf16 %v340_v2, %v339_v1  ;;  %v1042_v4 = vpack.c.bf16 %v340_v2, %v339_v1  ;;  %s1305_s9 = smov [#allocation8]  }
  0x58   : > { %1134 = vrot.lane.b32.xlu0 %v1133_v3, %s1297_s24 }
  0x5c   : > { %1139 = vrot.lane.b32.xlu0 %v1133_v3, %s1298_s25  ;;  %v727_v3 = vld [vmem:[#allocation6 + $0x10] sm:$0xff] }
  0xca   : > { %v1135_v6 = vpop.permute.xlu0 %1134 }
  0xcb   : > { %v1137_v7 = vunpack.i.h.bf16 %v1135_v6  ;;  %v1136_v8 = vunpack.i.l.bf16 %v1135_v6  ;;  %1144 = vrot.lane.b32.xlu1 %v1135_v6, %s1298_s25 }
  0xcd   : > { %v1045_v9 = vpack.c.bf16 %v1137_v7, %v1136_v8 }
  0xce   : > { %v1140_v10 = vpop.permute.xlu0 %1139 }
  0xcf   : > { %v1142_v11 = vunpack.i.h.bf16 %v1140_v10  ;;  %v1141_v12 = vunpack.i.l.bf16 %v1140_v10  ;;  %v828_v10 = vld [vmem:[%s1586_s6] sm:$0xff] }
  0xd1   : > { %v1036_v13 = vpack.c.bf16 %v1142_v11, %v1141_v12 }
  0xd3   : > { %1037 = vmatpush3.bf16.msra.mxu0 %v1036_v13 }
  0xd4   : > { %1038 = vmatprep.subr.bf16.mxu0 %v1296_v0 }
 0x13d   : > { %v1145_v14 = vpop.permute.xlu1 %1144 }
 0x13e   : > { %v1147_v15 = vunpack.i.h.bf16 %v1145_v14  ;;  %v1146_v16 = vunpack.i.l.bf16 %v1145_v14 }
 0x140   : > { %v1039_v17 = vpack.c.bf16 %v1147_v15, %v1146_v16 }
 0x142   : > { %1040 = vmatpush3.bf16.msra.mxu0 %v1039_v17 }
 0x143   : > { %1041 = vmatprep.subr.bf16.mxu0 %v1296_v0 }
 0x145   : > { %995 = vmatmul.mubr.msk.f32.vlgmr.msra.gmra.mrb[0].mxu0 %vm364_vm1, %v351_v18 }
 0x146   : > { %1043 = vmatpush3.bf16.msra.mxu0 %v1042_v4  ;;  %1005 = vmatprep.mubr.msk.f32.mxu0 %vm1299_vm0, %v1300_v5 }
 0x147   : > { %1044 = vmatprep.subr.bf16.mxu0 %v1296_v0 }
 0x14a   : > { %1046 = vmatpush3.bf16.msra.mxu0 %v1045_v9 }
 0x14d   : > { %1006 = vmatmul.mubr.msk.f32.vlgmr.msra.gmra.mrb[0].mxu0 %vm364_vm1, %v349_v19 }
 0x220   : > { %v507_v22 = vpop.f32.mrb[0].mxu0 }
 0x221   : > { %v517_v23 = vmul.f32 %v1493_v21, %v507_v22  ;;  %v1007_v24 = vpop.f32.mrb[1].mxu0 }
 0x223   : > { %v519_v25 = vsel %vm518_vm2, %v517_v23, 0.0  ;;  %v523_v26 = vmul.f32 %v517_v23, %v517_v23 }
 0x224   : > { %520 = vadd.xlane.f32.xlu1 %v519_v25 }
 0x225   : > { %v524_v27 = vsel %vm518_vm2, %v523_v26, 0.0 }
 0x226   : > { %525 = vadd.xlane.f32.xlu0 %v524_v27 }
 0x235   : > { %545 = vperm.xlu1 %1149, %v542_v28  }
 0x23c   : > { %538 = vperm.xlu0 %1148, %v535_v29  }
 0x2b1   : > { %v521_v30 = vpop.xlane.xlu1 %520 }
 0x2b2   : > { %v522_v31 = vmul.f32 0.015625, %v521_v30 }
 0x2b3   : > { %v526_v32 = vpop.xlane.xlu0 %525 }
 0x2b4   : > { %v528_v33 = vmul.f32 %v522_v31, %v522_v31  ;;  %v527_v34 = vmul.f32 0.015625, %v526_v32  ;;  %v531_v38 = vsub.f32 %v517_v23, %v522_v31 }
 0x2b5   : > { %v546_v42 = vpop.permute.xlu1 %545 }
 0x2b6   : > { %v529_v35 = vsub.f32 %v527_v34, %v528_v33 }
 0x2b8   : > { %v530_v36 = vmax.f32 %v529_v35, 0.0 }
 0x2ba   : > { %v532_v37 = vadd.f32 1e-05, %v530_v36 }
 0x2bb   : > { %v539_v40 = vpop.permute.xlu0 %538 }
 0x2bc   : > { %1160 = vrsqrt.f32 %v532_v37 }
 0x2c6   : > { %v1161_v39 = vpop.eup %1160 }
 0x2c7   : > { %v534_v41 = vmul.f32 %v1161_v39, %v531_v38 }
 0x2c9   : > { %v541_v43 = vmul.f32 %v539_v40, %v534_v41 }
 0x2cb   : > { %v548_v44 = vadd.f32 %v546_v42, %v541_v43 }
 0x2cd   : > { %vm549_vm5 = vcmp.ge.f32.partialorder %v548_v44, 0.0  ;;  %v550_v45 = vmul.f32 0.01, %v548_v44 }
 0x2cf   : > { %v551_v46 = vsel %vm549_vm5, %v548_v44, %v550_v45 }
 0x2d0   : > { %v552_v47 = vmul.f32 %v1493_v21, %v551_v46 }
 0x2d2   : > { %554 = vrot.lane.b32.xlu1 %v552_v47, %s1302_s29 }
 0x344   : > { %v555_v48 = vpop.permute.xlu1 %554 }
 0x345   : > { %558 = vst.msk [vmem:[#allocation2] sm:$0xff] %vm557_vm6, %v555_v48 }
 0x34c   : > { %v559_v49 = vld [vmem:[#allocation2] sm:$0xff] }
 0x34d   : > { %561 = vrot.lane.b32.xlu1 %v559_v49, %s1297_s24  ;;  %s326_s24 = sand.u32 1, %s1282_s28  }
 0x34e   : > { %s848_s29 = scalar_lea.sflag [#allocation5], %s326_s24 }
 0x351   : > { %564 = vrot.lane.b32.xlu1 %v559_v49, %s1303_s14 }
 0x3bf   : > { %v562_v50 = vpop.permute.xlu1 %561 }
 0x3c0   : > { %v1150_v51 = vpack.i.bf16 %v562_v50, %v559_v49  ;;  %v1051_v59 = vpack.c.bf16 %v562_v50, %v559_v49 }
 0x3c2   : > { %1151 = vrot.lane.b32.xlu1 %v1150_v51, %s1298_s25 }
 0x3c3   : > { %v565_v52 = vpop.permute.xlu1 %564 }
 0x3c6   : > { %574 = vrot.lane.b32.xlu1 %v565_v52, %s1298_s25  ;;  %s950_s25 = sshll.u32 %s326_s24, 3 }
 0x3c7   : > { %s328_s10 = scalar_lea.vmem [#allocation8], %s950_s25 }
 0x3c8   : > { %s861_s12 = sshll.u32 %s328_s10, 4  ;;  %s1539_s12 = int_to_ptr.vmem [resolvable:$true] %s861_s12 }
 0x3c9   : > { %s1220_s14 = scalar_lea.vmem %s1539_s12, 128 }
 0x3ca   : > { %1156 = vrot.lane.b32.xlu1 %v1150_v51, %s1304_s20  ;;  %p1221_p12 = scmp.ne.s32.totalorder %s1539_s12, %s1220_s14 }
 0x3cc   : > { %p1222_p2 = pnand %p1221_p12, %p1604_p1 }
 0x3ce   : > { %732 = vrot.lane.b32.xlu1 %v565_v52, %s1304_s20  ;;  %p1223_p3 = pneg %p1222_p2  ;;  %s1224_s20 = sshll.u32 %s1305_s9, 4  ;;  %s1225_s20 = int_to_ptr.vmem [resolvable:$false] %s1224_s20 }
 0x3cf   : > { %s1226_s17 = scalar_lea.vmem %s1225_s20, 256  ;;  %p1227_p4 = scmp.lt.s32.totalorder %s1539_s12, %s1225_s20 }
 0x3d0   : > { %p1228_p7 = scmp.lt.s32.totalorder %s1226_s17, %s1220_s14 }
 0x3d2   : > { %p1229_p8 = por %p1228_p7, %p1227_p4 }
 0x3d4   : > { %p1230_p11 = pnand %p1229_p8, %p1223_p3 }
 0x434   : > { %v1152_v53 = vpop.permute.xlu1 %1151 }
 0x435   : > { %v1154_v54 = vunpack.i.h.bf16 %v1152_v53  ;;  %v1153_v55 = vunpack.i.l.bf16 %v1152_v53 }
 0x437   : > { %v1048_v56 = vpack.c.bf16 %v1154_v54, %v1153_v55 }
 0x438   : > { %v575_v57 = vpop.permute.xlu1 %574 }
 0x439   : > { %1049 = vmatpush3.bf16.msra.mxu1 %v1048_v56 }
 0x43a   : > { %1012 = vmatprep.subr.mxu1 %v1300_v5 }
 0x43c   : > { %v1157_v60 = vpop.permute.xlu1 %1156 }
 0x43d   : > { %1013 = vmatpush3.msra.mxu1 %v575_v57  ;;  %v1159_v61 = vunpack.i.h.bf16 %v1157_v60  ;;  %v1158_v62 = vunpack.i.l.bf16 %v1157_v60 }
 0x43e   : > { %1015 = vmatmul.mubr.msk.f32.vlgmr.msra.gmra.mrb[0].mxu1 %vm579_vm7, %v569_v58  ;;  %1050 = vmatprep.subr.bf16.mxu1 %v1296_v0 }
 0x43f   : > { %1052 = vmatpush3.bf16.msra.mxu1 %v1051_v59  ;;  %1023 = vmatprep.mubr.msk.f32.mxu1 %vm1299_vm0, %v1300_v5  ;;  %v1054_v1 = vpack.c.bf16 %v1159_v61, %v1158_v62 }
 0x440   : > { %1021 = vmatprep.subr.mxu1 %v1300_v5  ;;  %v733_v2 = vpop.permute.xlu1 %732 }
 0x443   : > { %1022 = vmatpush3.msra.mxu1 %v565_v52 }
 0x444   : > { %1053 = vmatprep.subr.bf16.mxu1 %v1296_v0 }
 0x446   : > { %1024 = vmatmul.mubr.msk.f32.vlgmr.msra.gmra.mrb[0].mxu1 %vm579_vm7, %v567_v63 }
 0x447   : > { %1055 = vmatpush3.bf16.msra.mxu1 %v1054_v1  ;;  %1032 = vmatprep.mubr.msk.f32.mxu1 %vm1299_vm0, %v1300_v5 }
 0x448   : > { %1030 = vmatprep.subr.mxu1 %v1300_v5  ;;  %v835_v5 = vld [vmem:[%s1587_s7] sm:$0xff] }
 0x44b   : > { %1031 = vmatpush3.msra.mxu1 %v733_v2 }
 0x44e   : > { %1033 = vmatmul.mubr.msk.f32.vlgmr.msra.gmra.mrb[0].mxu1 %vm579_vm7, %v727_v3 }
 0x521   : > { %v806_v4 = vpop.f32.mrb[0].mxu1 }
 0x522   : > { %v811_v6 = vmul.f32 %v1493_v21, %v806_v4  ;;  %v1034_v7 = vpop.f32.mrb[1].mxu1 }
 0x524   : > { %v812_v0 = vsel %vm518_vm2, %v811_v6, 0.0  ;;  %v816_v8 = vmul.f32 %v811_v6, %v811_v6 }
 0x525   : > { %813 = vadd.xlane.f32.xlu0 %v812_v0 }
 0x526   : > { %v817_v9 = vsel %vm518_vm2, %v816_v8, 0.0 }
 0x527   : > { %818 = vadd.xlane.f32.xlu1 %v817_v9 }
 0x538   : > { %838 = vperm.xlu1 %1149, %v835_v5  }
 0x53b   : > { %831 = vperm.xlu0 %1148, %v828_v10  }
 0x5b2   : > { %v814_v11 = vpop.xlane.xlu0 %813 }
 0x5b3   : > { %v815_v12 = vmul.f32 0.015625, %v814_v11 }
 0x5b4   : > { %v819_v13 = vpop.xlane.xlu1 %818 }
 0x5b5   : > { %v821_v14 = vmul.f32 %v815_v12, %v815_v12  ;;  %v820_v15 = vmul.f32 0.015625, %v819_v13  ;;  %v824_v19 = vsub.f32 %v811_v6, %v815_v12 }
 0x5b7   : > { %v822_v16 = vsub.f32 %v820_v15, %v821_v14 }
 0x5b8   : > { %v839_v25 = vpop.permute.xlu1 %838 }
 0x5b9   : > { %v823_v17 = vmax.f32 %v822_v16, 0.0 }
 0x5ba   : > { %v832_v23 = vpop.permute.xlu0 %831 }
 0x5bb   : > { %v825_v18 = vadd.f32 1e-05, %v823_v17 }
 0x5bd   : > { %1162 = vrsqrt.f32 %v825_v18 }
 0x5c7   : > { %v1163_v20 = vpop.eup %1162 }
 0x5c8   : > { %v827_v22 = vmul.f32 %v1163_v20, %v824_v19 }
 0x5ca   : > { %v834_v24 = vmul.f32 %v832_v23, %v827_v22 }
 0x5cc   : > { %v841_v26 = vadd.f32 %v839_v25, %v834_v24 }
 0x5ce   : > { %vm842_vm8 = vcmp.ge.f32.partialorder %v841_v26, 0.0  ;;  %v843_v27 = vmul.f32 0.01, %v841_v26 }
 0x5d0   : > { %v844_v28 = vsel %vm842_vm8, %v841_v26, %v843_v27 }
 0x5d1   : > { %v845_v29 = vmul.f32 %v1493_v21, %v844_v28 }
 0x5d3   : > { %846 = vst.msk [vmem:[%s328_s10] sm:$0xff] %vm518_vm2, %v845_v29 }
 0x5d4   : > { %1233 = shalt.err (!%p1230_p11)
}
 0x5d5   : > { %s1234_s22 = scalar_lea.hbm %s1537_s19, 128  ;;  %s1238_s24 = scalar_lea.hbm %s1588_s8, 256 }
 0x5d6   : > { %p1235_p13 = scmp.ne.s32.totalorder %s1537_s19, %s1234_s22  ;;  %p1239_p6 = scmp.lt.u32.totalorder %s1537_s19, %s1588_s8 }
 0x5d7   : > { %p1240_p9 = scmp.lt.u32.totalorder %s1238_s24, %s1234_s22  ;;  %p1242_p12 = scmp.lt.u32.totalorder %s1234_s22, %s1537_s19 }
 0x5d8   : > { %p1236_p5 = pnand %p1235_p13, %p1604_p1 }
 0x5d9   : > { %p1241_p10 = por %p1240_p9, %p1239_p6 }
 0x5da   : > { %p1237_p0 = pneg %p1236_p5 }
 0x5db   : > { %p1243_p2 = por %p1242_p12, %p1241_p10 }
 0x5dd   : > { %p1244_p3 = pnand %p1243_p2, %p1237_p0 }
 0x5df   : > { %1247 = shalt.err (!%p1244_p3)
}
 0x5e0   : > { %1070 = dma.vmem_to_hbm [thread:$0]  (%p1604_p1), %s1539_s12, 128, %s1537_s19, %s848_s29  }
 0x5e1 PF: > { %p1087_p4 = scmp.ge.s32.totalorder %s1290_s30, 2  ;;  %s873_s10 = sand.u32 1, %s1278_s27  }
 0x5e2   : > { %p1605_p7 = scmp.ne.s32.totalorder %s1596_s16, 0  ;;  %s874_s13 = scalar_lea.sflag [#allocation5], %s873_s10 }
 0x5e4   : > { %p1080_p8 = pnand %p1087_p4, %p1605_p7 }
 0x5e6   : > { %1273 = dma.done.wait (!%p1080_p8), %s874_s13, 128  }
 0x5e7   : > { %1275 = vsyncadd (!%p1080_p8), %s874_s13, 4294967168  ;;  %s1606_s18 = sld [smem:[#allocation12_spill]]  ;;  %s1607_s29 = sld [smem:[#allocation13_spill]] }
 0x5e8   : > { %p20_p11 = scmp.ge.s32.totalorder %s1376_s11, 4   ;;  %s1608_s27 = smov %s1282_s28 }
 0x5e9   : > { %s1610_s30 = smov %s1376_s11 }
 0x5ea   :  { %22 = sbr.rel (!%p20_p11) target bundleno = 5 (0x5), region = 99 }
 0x5ed   : > { %s1609_s28 = smov %s1606_s18 }
 0x5f1   :  { %879 = vsyncpa [#allocation4], 1 }
 0x5f2   :  { %881 = vsyncpa [#allocation4 + $0x1], 1 }
 0x5f3   :  { %882 = vsyncpa [#allocation7], 1 }
 0x5f4   :  { %883 = vsyncpa [#allocation5], 1 }
 0x5f5   :  { %885 = vsyncpa [#allocation5 + $0x1], 1 }

</bundles_post_ra>
